<compile_context>
chip_gen: v7x
topology: tpu7x:2x2x1
jax: 0.10.0
libtpu: 0.0.40
codegen_flags: <defaults>
</compile_context>

<pallas_src>
import functools

import jax
import jax.numpy as jnp
from jax.experimental import pallas as pl
from jax.experimental.pallas import tpu as pltpu

LANES = 128                       # lanes per row (fast axis)
SUBLANES = 8                      # sublane tile
MAX_STEP_BYTES = 6 * 1024 * 1024  # per-step input payload budget (x2 double-buffered)
VMEM_LIMIT_BYTES = 32 * 1024 * 1024


def _cdiv(a, b):
    return -(-a // b)


def _round_up(x, m):
    return _cdiv(x, m) * m


@functools.lru_cache(maxsize=1)
def _num_tensorcores_per_chip():
    """Size of the leading 'parallel' grid axis.

    2 only where a single JAX device hides 2 TensorCores (v7x, v4/v5p megacore);
    1 on v5e / v6e (and anything unknown) so the axis is never pure padding overhead.
    """
    try:
        kind = jax.devices()[0].device_kind.lower()
    except Exception:
        return 1
    if "lite" in kind or "v5e" in kind or "v6e" in kind:
        return 1
    if "v7" in kind or "v4" in kind or "v5" in kind:
        return 2
    return 1


def _neuconw_loss_kernel(c_ref, t_ref, m3_ref, g_ref, me_ref, d_ref, f_ref, out_ref):
    # c_ref, t_ref, m3_ref : (tile_c, 128) VMEM -- flattened color / target / per-element mask
    # g/me/d/f_ref         : (tile_s, 128) VMEM -- aux error streams (per-stream tile rows)
    # out_ref              : (1, 6, 8, 128) VMEM -- per-core accumulator (resident across steps)
    i = pl.program_id(1)

    @pl.when(i == 0)
    def _init():
        out_ref[...] = jnp.zeros_like(out_ref)

    def fold(x):
        # (R, 128) -> (8, 128); R is a static multiple of 8 so the reshape is
        # (8,128)-tile aligned and the reduction is pure VPU adds over row-groups.
        r = x.shape[0]
        return x.reshape(r // SUBLANES, SUBLANES, LANES).sum(axis=0)

    # Exact PyTorch semantics: sum |(color - target) * mask| with per-element mask.
    color_err = jnp.abs((c_ref[...] - t_ref[...]) * m3_ref[...])

    out_ref[0, 0] += fold(color_err)     # masked L1 color error
    out_ref[0, 1] += fold(m3_ref[...])   # 3 * mask sum
    out_ref[0, 2] += fold(g_ref[...])    # gradient_error sum
    out_ref[0, 3] += fold(me_ref[...])   # mask_error sum
    out_ref[0, 4] += fold(d_ref[...])    # sfm_depth_loss sum
    out_ref[0, 5] += fold(f_ref[...])    # floor_normal_error sum


def _pack_stream(x_flat, tile_rows, steps_total):
    """Flat (n,) f32 -> lane-dense (steps_total*tile_rows, 128) slab (zero-padded)."""
    padded_rows = tile_rows * steps_total
    pad = padded_rows * LANES - x_flat.shape[0]
    if pad:
        x_flat = jnp.pad(x_flat, (0, pad))
    return x_flat.reshape(padded_rows, LANES)


@functools.partial(jax.jit, static_argnames=(
    "coef", "igr_weight", "mask_weight", "depth_weight",
    "mesh_mask_list", "depth_loss", "floor_normal"))
def neuconw_loss(inputs, targets, masks=None, *,
                 coef=1.0, igr_weight=0.1, mask_weight=0.1, depth_weight=0.1,
                 mesh_mask_list=True, depth_loss=True, floor_normal=True):
    # NOTE: reproduces the PyTorch __init__ exactly, including floor_weight being
    # overwritten by depth_weight (self.floor_weight = depth_weight).
    floor_weight = depth_weight

    targets = targets.astype(jnp.float32)
    color = inputs["color"].astype(jnp.float32)
    n_rays = targets.shape[0]
    if masks is None:
        masks = jnp.ones((n_rays, 1), dtype=jnp.float32)
    masks = masks.astype(jnp.float32).reshape(n_rays, 1)

    # Aux terms may have arbitrary element counts (PyTorch uses .mean()); each gets
    # its own lane-dense stream.
    grad = inputs["gradient_error"].astype(jnp.float32).reshape(-1)
    maske = inputs["mask_error"].astype(jnp.float32).reshape(-1)
    depth = inputs["sfm_depth_loss"].astype(jnp.float32).reshape(-1)
    floor = inputs["floor_normal_error"].astype(jnp.float32).reshape(-1)

    # ---- lane-dense flat streams: contiguous reshapes, NO concatenate/transpose ----
    c_flat = color.reshape(-1)                                   # (3N,)  free reshape
    t_flat = targets.reshape(-1)                                 # (3N,)  free reshape
    m3_flat = jnp.broadcast_to(masks, (n_rays, 3)).reshape(-1)   # (3N,)  one 12N-byte write
    # TODO(synk): if upstream produces bf16, these slabs could stay bf16 on v6e/v7x
    # (accumulate in f32 in-kernel) to halve HBM bytes; kept f32 to match the spec.

    streams = [c_flat, t_flat, m3_flat, grad, maske, depth, floor]
    sizes = [int(s.shape[0]) for s in streams]

    num_cores = _num_tensorcores_per_chip()

    total_bytes = 4 * sum(sizes)
    steps_needed = max(1, _cdiv(total_bytes, MAX_STEP_BYTES))
    steps_total = _round_up(steps_needed, num_cores)
    steps_per_core = steps_total // num_cores

    # Per-stream block rows (multiple of 8); padding per stream <= 8*steps_total rows.
    tiles = [max(SUBLANES, _round_up(_cdiv(_cdiv(n, LANES), steps_total), SUBLANES))
             for n in sizes]
    slabs = [_pack_stream(s, tr, steps_total) for s, tr in zip(streams, tiles)]

    def _row_map(spc):
        return lambda c, i: (c * spc + i, 0)

    in_specs = [pl.BlockSpec((tr, LANES), _row_map(steps_per_core)) for tr in tiles]

    padded_elems = sum(tr * steps_total * LANES for tr in tiles)
    out_elems = num_cores * 6 * SUBLANES * LANES
    cost = pl.CostEstimate(
        flops=4 * tiles[0] * steps_total * LANES + padded_elems,
        transcendentals=0,
        bytes_accessed=4 * (padded_elems + out_elems))

    partials = pl.pallas_call(
        _neuconw_loss_kernel,
        out_shape=jax.ShapeDtypeStruct((num_cores, 6, SUBLANES, LANES), jnp.float32),
        grid_spec=pltpu.PrefetchScalarGridSpec(
            num_scalar_prefetch=0,
            grid=(num_cores, steps_per_core),
            in_specs=in_specs,
            out_specs=pl.BlockSpec((1, 6, SUBLANES, LANES),
                                   lambda c, i: (c, 0, 0, 0)),
        ),
        compiler_params=pltpu.CompilerParams(
            dimension_semantics=("parallel", "arbitrary"),
            vmem_limit_bytes=VMEM_LIMIT_BYTES),
        cost_estimate=cost,
    )(*slabs)

    # Tiny final reduce of (cores, 6, 8, 128) partials in XLA.
    sums = jnp.sum(partials, axis=(0, 2, 3))   # (6,)
    color_sum, mask3_sum = sums[0], sums[1]
    grad_sum, maske_sum, depth_sum, floor_sum = sums[2], sums[3], sums[4], sums[5]
    mask_sum = mask3_sum / 3.0                 # mask broadcast 3x -> divide back

    ret = {}
    ret["color_loss"] = color_sum / (mask_sum + 1e-5)
    ret["normal_loss"] = igr_weight * (grad_sum / float(sizes[3]))
    if mesh_mask_list:
        ret["mask_error"] = mask_weight * (maske_sum / float(sizes[4]))
    if depth_loss:
        ret["sfm_depth_loss"] = depth_weight * (depth_sum / float(sizes[5]))
    if floor_normal:
        ret["floor_normal_error"] = floor_weight * (floor_sum / float(sizes[6]))
    for k in ret:
        ret[k] = coef * ret[k]
    return ret


def _reference(inputs, targets, masks, *, coef=1.0, igr_weight=0.1,
               mask_weight=0.1, depth_weight=0.1):
    floor_weight = depth_weight
    mask_sum = masks.sum() + 1e-5
    color_error = (inputs["color"] - targets) * masks
    ret = {}
    ret["color_loss"] = jnp.abs(color_error).sum() / mask_sum
    ret["normal_loss"] = igr_weight * inputs["gradient_error"].mean()
    ret["mask_error"] = mask_weight * inputs["mask_error"].mean()
    ret["sfm_depth_loss"] = depth_weight * inputs["sfm_depth_loss"].mean()
    ret["floor_normal_error"] = floor_weight * inputs["floor_normal_error"].mean()
    return {k: coef * v for k, v in ret.items()}


if __name__ == "__main__":
    key = jax.random.PRNGKey(0)
    k1, k2, k3, k4, k5, k6, k7 = jax.random.split(key, 7)

    N = 997  # number of rays (non-multiple of 128 to exercise padding)
    color = jax.random.uniform(k1, (N, 3), dtype=jnp.float32)
    targets = jax.random.uniform(k2, (N, 3), dtype=jnp.float32)
    masks = (jax.random.uniform(k3, (N, 1)) > 0.3).astype(jnp.float32)

    inputs = {
        "color": color,
        # aux terms deliberately have different element counts (allowed by the spec)
        "gradient_error": jax.random.uniform(k4, (2048, 1), dtype=jnp.float32),
        "mask_error": jax.random.uniform(k5, (N, 1), dtype=jnp.float32),
        "sfm_depth_loss": jax.random.uniform(k6, (777, 1), dtype=jnp.float32),
        "floor_normal_error": jax.random.uniform(k7, (N, 1), dtype=jnp.float32),
    }

    ret = neuconw_loss(inputs, targets, masks)
    ret = jax.block_until_ready(ret)

    ref = _reference(inputs, targets, masks)
    for k in ref:
        assert jnp.allclose(ret[k], ref[k], rtol=1e-5, atol=1e-5), (
            k, ret[k], ref[k])

    print("KERNEL_OK")
</pallas_src>

<mosaic_0001>
module attributes {stable_mosaic.version = 11 : i64} {
  func.func @_neuconw_loss_kernel(%arg0: i32, %arg1: i32, %arg2: memref<24x128xf32, #tpu.memory_space<vmem>>, %arg3: memref<24x128xf32, #tpu.memory_space<vmem>>, %arg4: memref<24x128xf32, #tpu.memory_space<vmem>>, %arg5: memref<16x128xf32, #tpu.memory_space<vmem>>, %arg6: memref<8x128xf32, #tpu.memory_space<vmem>>, %arg7: memref<8x128xf32, #tpu.memory_space<vmem>>, %arg8: memref<8x128xf32, #tpu.memory_space<vmem>>, %arg9: memref<1x6x8x128xf32, #tpu.memory_space<vmem>>) attributes {dimension_semantics = [#tpu.dimension_semantics<parallel>, #tpu.dimension_semantics<arbitrary>], iteration_bounds = array<i64: 1, 1>, scalar_prefetch = 0 : i64, scratch_operands = 0 : i64, tpu.core_type = #tpu.core_type<tc>, window_params = [{transform_indices = @transform_0, window_bounds = array<i64: 24, 128>}, {transform_indices = @transform_1, window_bounds = array<i64: 24, 128>}, {transform_indices = @transform_2, window_bounds = array<i64: 24, 128>}, {transform_indices = @transform_3, window_bounds = array<i64: 16, 128>}, {transform_indices = @transform_4, window_bounds = array<i64: 8, 128>}, {transform_indices = @transform_5, window_bounds = array<i64: 8, 128>}, {transform_indices = @transform_6, window_bounds = array<i64: 8, 128>}, {transform_indices = @transform_7, window_bounds = array<i64: 1, 6, 8, 128>}]} {
    %c0_i32 = arith.constant 0 : i32
    %0 = arith.cmpi eq, %arg1, %c0_i32 : i32
    %1 = arith.extui %0 : i1 to i32
    %c0_i32_0 = arith.constant 0 : i32
    %2 = arith.cmpi ne, %1, %c0_i32_0 : i32
    scf.if %2 {
      %cst_64 = arith.constant 0.000000e+00 : f32
      %62 = vector.broadcast %cst_64 : f32 to vector<1x6x8x128xf32>
      %c0_65 = arith.constant 0 : index
      %c0_66 = arith.constant 0 : index
      %c0_67 = arith.constant 0 : index
      %c0_68 = arith.constant 0 : index
      %63 = vector.load %arg9[%c0_65, %c0_66, %c0_67, %c0_68] : memref<1x6x8x128xf32, #tpu.memory_space<vmem>>, vector<1x6x8x128xf32>
      tpu.vector_store %arg9[%c0_65, %c0_66, %c0_67, %c0_68], %62 {strides = array<i32>} : memref<1x6x8x128xf32, #tpu.memory_space<vmem>>, vector<1x6x8x128xf32>,
    } else {
    }
    %c0 = arith.constant 0 : index
    %c0_1 = arith.constant 0 : index
    %3 = vector.load %arg2[%c0, %c0_1] : memref<24x128xf32, #tpu.memory_space<vmem>>, vector<24x128xf32>
    %c0_2 = arith.constant 0 : index
    %c0_3 = arith.constant 0 : index
    %4 = vector.load %arg3[%c0_2, %c0_3] : memref<24x128xf32, #tpu.memory_space<vmem>>, vector<24x128xf32>
    %5 = arith.subf %3, %4 : vector<24x128xf32>
    %c0_4 = arith.constant 0 : index
    %c0_5 = arith.constant 0 : index
    %6 = vector.load %arg4[%c0_4, %c0_5] : memref<24x128xf32, #tpu.memory_space<vmem>>, vector<24x128xf32>
    %7 = arith.mulf %5, %6 : vector<24x128xf32>
    %8 = math.absf %7 : vector<24x128xf32>
    %c0_6 = arith.constant 0 : index
    %c0_7 = arith.constant 0 : index
    %c0_8 = arith.constant 0 : index
    %c0_9 = arith.constant 0 : index
    %9 = vector.load %arg9[%c0_6, %c0_7, %c0_8, %c0_9] : memref<1x6x8x128xf32, #tpu.memory_space<vmem>>, vector<1x1x8x128xf32>
    %10 = vector.shape_cast %9 : vector<1x1x8x128xf32> to vector<8x128xf32>
    %11 = vector.shape_cast %8 : vector<24x128xf32> to vector<3x8x128xf32>
    %cst = arith.constant dense<0.000000e+00> : vector<8x128xf32>
    %12 = vector.multi_reduction <add>, %11, %cst [0] : vector<3x8x128xf32> to vector<8x128xf32>
    %13 = arith.addf %10, %12 : vector<8x128xf32>
    %c0_10 = arith.constant 0 : index
    %c0_11 = arith.constant 0 : index
    %c0_12 = arith.constant 0 : index
    %c0_13 = arith.constant 0 : index
    %14 = vector.load %arg9[%c0_10, %c0_11, %c0_12, %c0_13] : memref<1x6x8x128xf32, #tpu.memory_space<vmem>>, vector<1x1x8x128xf32>
    %15 = vector.shape_cast %14 : vector<1x1x8x128xf32> to vector<8x128xf32>
    %16 = vector.shape_cast %13 : vector<8x128xf32> to vector<1x1x8x128xf32>
    tpu.vector_store %arg9[%c0_10, %c0_11, %c0_12, %c0_13], %16 {strides = array<i32>} : memref<1x6x8x128xf32, #tpu.memory_space<vmem>>, vector<1x1x8x128xf32>,
    %c0_14 = arith.constant 0 : index
    %c1 = arith.constant 1 : index
    %c0_15 = arith.constant 0 : index
    %c0_16 = arith.constant 0 : index
    %17 = vector.load %arg9[%c0_14, %c1, %c0_15, %c0_16] : memref<1x6x8x128xf32, #tpu.memory_space<vmem>>, vector<1x1x8x128xf32>
    %18 = vector.shape_cast %17 : vector<1x1x8x128xf32> to vector<8x128xf32>
    %c0_17 = arith.constant 0 : index
    %c0_18 = arith.constant 0 : index
    %19 = vector.load %arg4[%c0_17, %c0_18] : memref<24x128xf32, #tpu.memory_space<vmem>>, vector<24x128xf32>
    %20 = vector.shape_cast %19 : vector<24x128xf32> to vector<3x8x128xf32>
    %cst_19 = arith.constant dense<0.000000e+00> : vector<8x128xf32>
    %21 = vector.multi_reduction <add>, %20, %cst_19 [0] : vector<3x8x128xf32> to vector<8x128xf32>
    %22 = arith.addf %18, %21 : vector<8x128xf32>
    %c0_20 = arith.constant 0 : index
    %c1_21 = arith.constant 1 : index
    %c0_22 = arith.constant 0 : index
    %c0_23 = arith.constant 0 : index
    %23 = vector.load %arg9[%c0_20, %c1_21, %c0_22, %c0_23] : memref<1x6x8x128xf32, #tpu.memory_space<vmem>>, vector<1x1x8x128xf32>
    %24 = vector.shape_cast %23 : vector<1x1x8x128xf32> to vector<8x128xf32>
    %25 = vector.shape_cast %22 : vector<8x128xf32> to vector<1x1x8x128xf32>
    tpu.vector_store %arg9[%c0_20, %c1_21, %c0_22, %c0_23], %25 {strides = array<i32>} : memref<1x6x8x128xf32, #tpu.memory_space<vmem>>, vector<1x1x8x128xf32>,
    %c0_24 = arith.constant 0 : index
    %c2 = arith.constant 2 : index
    %c0_25 = arith.constant 0 : index
    %c0_26 = arith.constant 0 : index
    %26 = vector.load %arg9[%c0_24, %c2, %c0_25, %c0_26] : memref<1x6x8x128xf32, #tpu.memory_space<vmem>>, vector<1x1x8x128xf32>
    %27 = vector.shape_cast %26 : vector<1x1x8x128xf32> to vector<8x128xf32>
    %c0_27 = arith.constant 0 : index
    %c0_28 = arith.constant 0 : index
    %28 = vector.load %arg5[%c0_27, %c0_28] : memref<16x128xf32, #tpu.memory_space<vmem>>, vector<16x128xf32>
    %29 = vector.shape_cast %28 : vector<16x128xf32> to vector<2x8x128xf32>
    %cst_29 = arith.constant dense<0.000000e+00> : vector<8x128xf32>
    %30 = vector.multi_reduction <add>, %29, %cst_29 [0] : vector<2x8x128xf32> to vector<8x128xf32>
    %31 = arith.addf %27, %30 : vector<8x128xf32>
    %c0_30 = arith.constant 0 : index
    %c2_31 = arith.constant 2 : index
    %c0_32 = arith.constant 0 : index
    %c0_33 = arith.constant 0 : index
    %32 = vector.load %arg9[%c0_30, %c2_31, %c0_32, %c0_33] : memref<1x6x8x128xf32, #tpu.memory_space<vmem>>, vector<1x1x8x128xf32>
    %33 = vector.shape_cast %32 : vector<1x1x8x128xf32> to vector<8x128xf32>
    %34 = vector.shape_cast %31 : vector<8x128xf32> to vector<1x1x8x128xf32>
    tpu.vector_store %arg9[%c0_30, %c2_31, %c0_32, %c0_33], %34 {strides = array<i32>} : memref<1x6x8x128xf32, #tpu.memory_space<vmem>>, vector<1x1x8x128xf32>,
    %c0_34 = arith.constant 0 : index
    %c3 = arith.constant 3 : index
    %c0_35 = arith.constant 0 : index
    %c0_36 = arith.constant 0 : index
    %35 = vector.load %arg9[%c0_34, %c3, %c0_35, %c0_36] : memref<1x6x8x128xf32, #tpu.memory_space<vmem>>, vector<1x1x8x128xf32>
    %36 = vector.shape_cast %35 : vector<1x1x8x128xf32> to vector<8x128xf32>
    %c0_37 = arith.constant 0 : index
    %c0_38 = arith.constant 0 : index
    %37 = vector.load %arg6[%c0_37, %c0_38] : memref<8x128xf32, #tpu.memory_space<vmem>>, vector<8x128xf32>
    %38 = vector.shape_cast %37 : vector<8x128xf32> to vector<1x8x128xf32>
    %cst_39 = arith.constant dense<0.000000e+00> : vector<8x128xf32>
    %39 = vector.multi_reduction <add>, %38, %cst_39 [0] : vector<1x8x128xf32> to vector<8x128xf32>
    %40 = arith.addf %36, %39 : vector<8x128xf32>
    %c0_40 = arith.constant 0 : index
    %c3_41 = arith.constant 3 : index
    %c0_42 = arith.constant 0 : index
    %c0_43 = arith.constant 0 : index
    %41 = vector.load %arg9[%c0_40, %c3_41, %c0_42, %c0_43] : memref<1x6x8x128xf32, #tpu.memory_space<vmem>>, vector<1x1x8x128xf32>
    %42 = vector.shape_cast %41 : vector<1x1x8x128xf32> to vector<8x128xf32>
    %43 = vector.shape_cast %40 : vector<8x128xf32> to vector<1x1x8x128xf32>
    tpu.vector_store %arg9[%c0_40, %c3_41, %c0_42, %c0_43], %43 {strides = array<i32>} : memref<1x6x8x128xf32, #tpu.memory_space<vmem>>, vector<1x1x8x128xf32>,
    %c0_44 = arith.constant 0 : index
    %c4 = arith.constant 4 : index
    %c0_45 = arith.constant 0 : index
    %c0_46 = arith.constant 0 : index
    %44 = vector.load %arg9[%c0_44, %c4, %c0_45, %c0_46] : memref<1x6x8x128xf32, #tpu.memory_space<vmem>>, vector<1x1x8x128xf32>
    %45 = vector.shape_cast %44 : vector<1x1x8x128xf32> to vector<8x128xf32>
    %c0_47 = arith.constant 0 : index
    %c0_48 = arith.constant 0 : index
    %46 = vector.load %arg7[%c0_47, %c0_48] : memref<8x128xf32, #tpu.memory_space<vmem>>, vector<8x128xf32>
    %47 = vector.shape_cast %46 : vector<8x128xf32> to vector<1x8x128xf32>
    %cst_49 = arith.constant dense<0.000000e+00> : vector<8x128xf32>
    %48 = vector.multi_reduction <add>, %47, %cst_49 [0] : vector<1x8x128xf32> to vector<8x128xf32>
    %49 = arith.addf %45, %48 : vector<8x128xf32>
    %c0_50 = arith.constant 0 : index
    %c4_51 = arith.constant 4 : index
    %c0_52 = arith.constant 0 : index
    %c0_53 = arith.constant 0 : index
    %50 = vector.load %arg9[%c0_50, %c4_51, %c0_52, %c0_53] : memref<1x6x8x128xf32, #tpu.memory_space<vmem>>, vector<1x1x8x128xf32>
    %51 = vector.shape_cast %50 : vector<1x1x8x128xf32> to vector<8x128xf32>
    %52 = vector.shape_cast %49 : vector<8x128xf32> to vector<1x1x8x128xf32>
    tpu.vector_store %arg9[%c0_50, %c4_51, %c0_52, %c0_53], %52 {strides = array<i32>} : memref<1x6x8x128xf32, #tpu.memory_space<vmem>>, vector<1x1x8x128xf32>,
    %c0_54 = arith.constant 0 : index
    %c5 = arith.constant 5 : index
    %c0_55 = arith.constant 0 : index
    %c0_56 = arith.constant 0 : index
    %53 = vector.load %arg9[%c0_54, %c5, %c0_55, %c0_56] : memref<1x6x8x128xf32, #tpu.memory_space<vmem>>, vector<1x1x8x128xf32>
    %54 = vector.shape_cast %53 : vector<1x1x8x128xf32> to vector<8x128xf32>
    %c0_57 = arith.constant 0 : index
    %c0_58 = arith.constant 0 : index
    %55 = vector.load %arg8[%c0_57, %c0_58] : memref<8x128xf32, #tpu.memory_space<vmem>>, vector<8x128xf32>
    %56 = vector.shape_cast %55 : vector<8x128xf32> to vector<1x8x128xf32>
    %cst_59 = arith.constant dense<0.000000e+00> : vector<8x128xf32>
    %57 = vector.multi_reduction <add>, %56, %cst_59 [0] : vector<1x8x128xf32> to vector<8x128xf32>
    %58 = arith.addf %54, %57 : vector<8x128xf32>
    %c0_60 = arith.constant 0 : index
    %c5_61 = arith.constant 5 : index
    %c0_62 = arith.constant 0 : index
    %c0_63 = arith.constant 0 : index
    %59 = vector.load %arg9[%c0_60, %c5_61, %c0_62, %c0_63] : memref<1x6x8x128xf32, #tpu.memory_space<vmem>>, vector<1x1x8x128xf32>
    %60 = vector.shape_cast %59 : vector<1x1x8x128xf32> to vector<8x128xf32>
    %61 = vector.shape_cast %58 : vector<8x128xf32> to vector<1x1x8x128xf32>
    tpu.vector_store %arg9[%c0_60, %c5_61, %c0_62, %c0_63], %61 {strides = array<i32>} : memref<1x6x8x128xf32, #tpu.memory_space<vmem>>, vector<1x1x8x128xf32>,
    return
  }
  func.func @transform_0(%arg0: i32, %arg1: i32) -> (i32, i32) {
    %c1_i32 = arith.constant 1 : i32
    %0 = arith.muli %arg0, %c1_i32 : i32
    %1 = arith.addi %0, %arg1 : i32
    %c0_i32 = arith.constant 0 : i32
    %c0_i32_0 = arith.constant 0 : i32
    return %1, %c0_i32 : i32, i32
  }
  func.func @transform_1(%arg0: i32, %arg1: i32) -> (i32, i32) {
    %c1_i32 = arith.constant 1 : i32
    %0 = arith.muli %arg0, %c1_i32 : i32
    %1 = arith.addi %0, %arg1 : i32
    %c0_i32 = arith.constant 0 : i32
    %c0_i32_0 = arith.constant 0 : i32
    return %1, %c0_i32 : i32, i32
  }
  func.func @transform_2(%arg0: i32, %arg1: i32) -> (i32, i32) {
    %c1_i32 = arith.constant 1 : i32
    %0 = arith.muli %arg0, %c1_i32 : i32
    %1 = arith.addi %0, %arg1 : i32
    %c0_i32 = arith.constant 0 : i32
    %c0_i32_0 = arith.constant 0 : i32
    return %1, %c0_i32 : i32, i32
  }
  func.func @transform_3(%arg0: i32, %arg1: i32) -> (i32, i32) {
    %c1_i32 = arith.constant 1 : i32
    %0 = arith.muli %arg0, %c1_i32 : i32
    %1 = arith.addi %0, %arg1 : i32
    %c0_i32 = arith.constant 0 : i32
    %c0_i32_0 = arith.constant 0 : i32
    return %1, %c0_i32 : i32, i32
  }
  func.func @transform_4(%arg0: i32, %arg1: i32) -> (i32, i32) {
    %c1_i32 = arith.constant 1 : i32
    %0 = arith.muli %arg0, %c1_i32 : i32
    %1 = arith.addi %0, %arg1 : i32
    %c0_i32 = arith.constant 0 : i32
    %c0_i32_0 = arith.constant 0 : i32
    return %1, %c0_i32 : i32, i32
  }
  func.func @transform_5(%arg0: i32, %arg1: i32) -> (i32, i32) {
    %c1_i32 = arith.constant 1 : i32
    %0 = arith.muli %arg0, %c1_i32 : i32
    %1 = arith.addi %0, %arg1 : i32
    %c0_i32 = arith.constant 0 : i32
    %c0_i32_0 = arith.constant 0 : i32
    return %1, %c0_i32 : i32, i32
  }
  func.func @transform_6(%arg0: i32, %arg1: i32) -> (i32, i32) {
    %c1_i32 = arith.constant 1 : i32
    %0 = arith.muli %arg0, %c1_i32 : i32
    %1 = arith.addi %0, %arg1 : i32
    %c0_i32 = arith.constant 0 : i32
    %c0_i32_0 = arith.constant 0 : i32
    return %1, %c0_i32 : i32, i32
  }
  func.func @transform_7(%arg0: i32, %arg1: i32) -> (i32, i32, i32, i32) {
    %c0_i32 = arith.constant 0 : i32
    %c0_i32_0 = arith.constant 0 : i32
    %c0_i32_1 = arith.constant 0 : i32
    %c0_i32_2 = arith.constant 0 : i32
    return %arg0, %c0_i32, %c0_i32_0, %c0_i32_1 : i32, i32, i32, i32
  }
}

</mosaic_0001>

<bundles_post_ra>
// kernel: neuconw_loss.1
= control target key start
LH: loop header
LB: loop body
LE: loop exit
PB: predicated region body
PF: predicated region fallthrough
CT: control target
= control target key end

     0   :  { %s389_s0 = inlined_call_operand.vmem [shape: f32[24,128], index: 0, kind: input, shape index: {}]   ;;  %s390_s1 = inlined_call_operand.vmem [shape: f32[24,128], index: 1, kind: input, shape index: {}]   ;;  %s391_s2 = inlined_call_operand.vmem [shape: f32[24,128], index: 2, kind: input, shape index: {}]   ;;  %s392_s3 = inlined_call_operand.vmem [shape: f32[16,128], index: 3, kind: input, shape index: {}]   ;;  %s393_s4 = inlined_call_operand.vmem [shape: f32[8,128], index: 4, kind: input, shape index: {}]   ;;  %s394_s5 = inlined_call_operand.vmem [shape: f32[8,128], index: 5, kind: input, shape index: {}]   ;;  %s395_s6 = inlined_call_operand.vmem [shape: f32[8,128], index: 6, kind: input, shape index: {}]   ;;  %s396_s7 = inlined_call_operand.vmem [shape: f32[1,6,8,128], index: 7, kind: output, shape index: {}]  }
   0x1   :  { %v175_v0 = vld [vmem:[%s389_s0] sm:$0xff]  ;;  %v176_v1 = vld [vmem:[%s389_s0 + $0x8] sm:$0xff]  ;;  %v177_v2 = vld [vmem:[%s389_s0 + $0x10] sm:$0xff] }
   0x2   :  { %v178_v3 = vld [vmem:[%s390_s1] sm:$0xff]  ;;  %v179_v4 = vld [vmem:[%s390_s1 + $0x8] sm:$0xff]  ;;  %v180_v5 = vld [vmem:[%s390_s1 + $0x10] sm:$0xff] }
   0x3   :  { %v181_v6 = vsub.f32 %v175_v0, %v178_v3  ;;  %v182_v7 = vsub.f32 %v176_v1, %v179_v4  ;;  %v183_v8 = vsub.f32 %v177_v2, %v180_v5  ;;  %v184_v9 = vld [vmem:[%s391_s2] sm:$0xff]  ;;  %v185_v10 = vld [vmem:[%s391_s2 + $0x8] sm:$0xff]  ;;  %v186_v11 = vld [vmem:[%s391_s2 + $0x10] sm:$0xff] }
   0x4   :  { %v203_v12 = vadd.f32 %v185_v10, %v184_v9  ;;  %v209_v13 = vld [vmem:[%s392_s3] sm:$0xff]  ;;  %v210_v14 = vld [vmem:[%s392_s3 + $0x8] sm:$0xff] }
   0x5   :  { %v216_v15 = vld [vmem:[%s393_s4] sm:$0xff]  ;;  %v187_v16 = vmul.f32 %v184_v9, %v181_v6  ;;  %v188_v17 = vmul.f32 %v185_v10, %v182_v7  ;;  %v189_v18 = vmul.f32 %v186_v11, %v183_v8  ;;  %v211_v19 = vadd.f32 %v210_v14, %v209_v13 }
   0x6   :  { %v222_v20 = vld [vmem:[%s394_s5] sm:$0xff]  ;;  %v204_v22 = vadd.f32 %v203_v12, %v186_v11  ;;  %283 = vst [vmem:[%s396_s7 + $0x18] sm:$0xff] %v216_v15 }
   0x7   :  { %v228_v21 = vld [vmem:[%s395_s6] sm:$0xff]  ;;  %v190_v23 = vand.u32 2147483647, %v187_v16  ;;  %v191_v24 = vand.u32 2147483647, %v188_v17  ;;  %285 = vst [vmem:[%s396_s7 + $0x20] sm:$0xff] %v222_v20 }
   0x8   :  { %v192_v25 = vand.u32 2147483647, %v189_v18  ;;  %287 = vst [vmem:[%s396_s7 + $0x28] sm:$0xff] %v228_v21  ;;  %281 = vst [vmem:[%s396_s7 + $0x10] sm:$0xff] %v211_v19 }
   0x9   :  { %v194_v26 = vadd.f32 %v191_v24, %v190_v23  ;;  %279 = vst [vmem:[%s396_s7 + $0x8] sm:$0xff] %v204_v22 }
   0xb   :  { %v195_v27 = vadd.f32 %v194_v26, %v192_v25 }
   0xd   :  { %197 = vst [vmem:[%s396_s7] sm:$0xff] %v195_v27 }

</bundles_post_ra>
